<compile_context>
chip_gen: v7x
topology: tpu7x:2x2x1
jax: 0.10.0
libtpu: 0.0.40
codegen_flags: <defaults>
</compile_context>

<pallas_src>
import functools

import jax
import jax.numpy as jnp
import numpy as np
from jax.experimental import pallas as pl
from jax.experimental.pallas import tpu as pltpu

LANE = 128          # lane width (last dim)
BF16_SUBLANE = 16   # bf16 packs 16 rows per sublane pair -> batch-tile rounding


def _round_up(n, m):
    return ((n + m - 1) // m) * m


def _autoencoder_kernel(x_ref,
                        w1, b1, w2, b2, w3, b3, w4, b4, w5, b5, w6, b6,
                        o_ref):
    """One batch tile: 6 fused Linear layers, ReLU after the first five."""

    def linear(h, w_ref, b_ref, relu):
        # MXU: bf16 x bf16 -> f32 accumulate.  Bias-add / ReLU in f32 on VPU.
        y = jnp.dot(h.astype(jnp.bfloat16), w_ref[...],
                    preferred_element_type=jnp.float32) + b_ref[...]
        return jnp.maximum(y, 0.0) if relu else y

    h = x_ref[...]                      # f32 [tb, input_size] (unpadded K)
    # encoder
    h = linear(h, w1, b1, True)
    h = linear(h, w2, b2, True)
    h = linear(h, w3, b3, True)
    # decoder
    h = linear(h, w4, b4, True)
    h = linear(h, w5, b5, True)
    h = linear(h, w6, b6, False)        # final layer: no ReLU
    o_ref[...] = h.astype(o_ref.dtype)  # lane-dense (128-padded) store


def prepare_params(params):
    """One-time preprocessing (call OUTSIDE the hot path).

    Pads every layer's output dim (and inner input dims) to multiples of 128
    and casts weights to bf16.  Layer 0's input dim is left at the true
    input_size so x never needs a feature-padded HBM copy.

    Returns (padded_params, real_dims) where real_dims is a hashable tuple of
    (fan_in, fan_out) per layer, usable as a static jit argument.
    """
    padded, real_dims = [], []
    for i, (w, b) in enumerate(params):
        fi, fo = w.shape
        real_dims.append((int(fi), int(fo)))
        fi_p = fi if i == 0 else _round_up(fi, LANE)
        fo_p = _round_up(fo, LANE)
        w_p = jnp.zeros((fi_p, fo_p), jnp.bfloat16)
        w_p = w_p.at[:fi, :fo].set(w.astype(jnp.bfloat16))
        b_p = jnp.zeros((1, fo_p), jnp.float32)
        b_p = b_p.at[0, :fo].set(b.reshape(-1).astype(jnp.float32))
        padded.append((w_p, b_p))
    return padded, tuple(real_dims)


@functools.partial(jax.jit, static_argnames=("real_dims", "block_batch"))
def autoencoder_forward(x, padded_params, real_dims, block_batch=512):
    """Fused forward pass.  `padded_params` comes from `prepare_params`."""
    batch, input_size = x.shape
    out_dim = real_dims[-1][1]
    out_pad = padded_params[-1][0].shape[1]

    # Batch tile: multiple of 16 (bf16 packing).  Small batches collapse to a
    # single grid step (no pipeline warm-up/drain); big batches get fat tiles
    # that shard across TensorCores on megacore parts.
    tb = _round_up(min(block_batch, batch), BF16_SUBLANE)
    batch_pad = _round_up(batch, tb)
    if batch_pad != batch:
        x = jnp.pad(x, ((0, batch_pad - batch), (0, 0)))  # fused under jit

    grid = (batch_pad // tb,)

    flat, wb_specs = [], []
    for w_p, b_p in padded_params:
        flat += [w_p, b_p]
        # Constant index_map -> weights/biases stay VMEM-resident across steps.
        wb_specs += [
            pl.BlockSpec(w_p.shape, lambda i: (0, 0)),
            pl.BlockSpec(b_p.shape, lambda i: (0, 0)),
        ]

    # Cost estimate with real (unpadded) dims.
    flops = 2 * batch * sum(fi * fo for fi, fo in real_dims)
    bytes_accessed = (batch * input_size * 4 + batch * out_dim * 4
                      + sum(w.size * 2 + b.size * 4 for w, b in padded_params))
    cost = pl.CostEstimate(flops=flops, transcendentals=0,
                           bytes_accessed=bytes_accessed)

    out = pl.pallas_call(
        _autoencoder_kernel,
        out_shape=jax.ShapeDtypeStruct((batch_pad, out_pad), x.dtype),
        grid=grid,
        in_specs=[pl.BlockSpec((tb, input_size), lambda i: (i, 0))] + wb_specs,
        out_specs=pl.BlockSpec((tb, out_pad), lambda i: (i, 0)),
        compiler_params=pltpu.CompilerParams(
            dimension_semantics=("parallel",)),   # megacore sharding on v7x
        cost_estimate=cost,
    )(x, *flat)

    # Slice with the decoder's true output width; fused under the same jit.
    return out[:batch, :out_dim]


def init_params(key, input_size, hidden_size1, hidden_size2, encoding_size):
    """nn.Linear-style init: uniform(-1/sqrt(fan_in), 1/sqrt(fan_in)).
    Weights stored as [in, out] (transposed vs PyTorch's [out, in])."""
    dims = [input_size, hidden_size1, hidden_size2, encoding_size,
            hidden_size2, hidden_size1, input_size]
    params = []
    for i in range(6):
        fan_in, fan_out = dims[i], dims[i + 1]
        key, kw, kb = jax.random.split(key, 3)
        bound = 1.0 / np.sqrt(fan_in)
        w = jax.random.uniform(kw, (fan_in, fan_out), jnp.float32, -bound, bound)
        b = jax.random.uniform(kb, (fan_out,), jnp.float32, -bound, bound)
        params.append((w, b))
    return params


def reference_forward(x, params, quantize_weights=False):
    """Pure-JAX reference. If quantize_weights, emulate the kernel's bf16 MXU
    operands (weights & activations rounded to bf16, f32 accumulation)."""
    h = x
    for i, (w, b) in enumerate(params):
        if quantize_weights:
            w = w.astype(jnp.bfloat16).astype(jnp.float32)
            h = h.astype(jnp.bfloat16).astype(jnp.float32)
        h = h @ w + b
        if i < 5:
            h = jnp.maximum(h, 0.0)
    return h


if __name__ == "__main__":
    batch = 64
    input_size, hidden_size1, hidden_size2, encoding_size = 64, 32, 16, 8

    key = jax.random.PRNGKey(0)
    key, kx = jax.random.split(key)
    x = jax.random.normal(kx, (batch, input_size), dtype=jnp.float32)

    params = init_params(key, input_size, hidden_size1, hidden_size2,
                         encoding_size)

    # One-time prep (padding + bf16 cast) -- kept out of the hot path.
    padded_params, real_dims = prepare_params(params)
    padded_params = jax.block_until_ready(padded_params)

    out = autoencoder_forward(x, padded_params, real_dims)
    out = jax.block_until_ready(out)
    out_np = np.asarray(out)

    # Tight check vs a reference using the same bf16 MXU-operand numerics.
    ref_bf16 = np.asarray(reference_forward(x, params, quantize_weights=True))
    np.testing.assert_allclose(out_np, ref_bf16, rtol=1e-3, atol=1e-3)

    # Loose check vs the pure-f32 PyTorch-equivalent forward.
    ref_f32 = np.asarray(reference_forward(x, params))
    np.testing.assert_allclose(out_np, ref_f32, rtol=5e-2, atol=5e-2)

    print("KERNEL_OK")
</pallas_src>

<mosaic_0001>
module attributes {stable_mosaic.version = 11 : i64} {
  func.func @_autoencoder_kernel(%arg0: i32, %arg1: memref<64x64xf32, #tpu.memory_space<vmem>>, %arg2: memref<64x128xbf16, #tpu.memory_space<vmem>>, %arg3: memref<1x128xf32, #tpu.memory_space<vmem>>, %arg4: memref<128x128xbf16, #tpu.memory_space<vmem>>, %arg5: memref<1x128xf32, #tpu.memory_space<vmem>>, %arg6: memref<128x128xbf16, #tpu.memory_space<vmem>>, %arg7: memref<1x128xf32, #tpu.memory_space<vmem>>, %arg8: memref<128x128xbf16, #tpu.memory_space<vmem>>, %arg9: memref<1x128xf32, #tpu.memory_space<vmem>>, %arg10: memref<128x128xbf16, #tpu.memory_space<vmem>>, %arg11: memref<1x128xf32, #tpu.memory_space<vmem>>, %arg12: memref<128x128xbf16, #tpu.memory_space<vmem>>, %arg13: memref<1x128xf32, #tpu.memory_space<vmem>>, %arg14: memref<64x128xf32, #tpu.memory_space<vmem>>) attributes {dimension_semantics = [#tpu.dimension_semantics<parallel>], iteration_bounds = array<i64: 1>, scalar_prefetch = 0 : i64, scratch_operands = 0 : i64, tpu.core_type = #tpu.core_type<tc>, window_params = [{transform_indices = @transform_0, window_bounds = array<i64: 64, 64>}, {pipeline_mode = #tpu.pipeline_mode<synchronous>, transform_indices = @transform_1, window_bounds = array<i64: 64, 128>}, {pipeline_mode = #tpu.pipeline_mode<synchronous>, transform_indices = @transform_2, window_bounds = array<i64: 1, 128>}, {pipeline_mode = #tpu.pipeline_mode<synchronous>, transform_indices = @transform_3, window_bounds = array<i64: 128, 128>}, {pipeline_mode = #tpu.pipeline_mode<synchronous>, transform_indices = @transform_4, window_bounds = array<i64: 1, 128>}, {pipeline_mode = #tpu.pipeline_mode<synchronous>, transform_indices = @transform_5, window_bounds = array<i64: 128, 128>}, {pipeline_mode = #tpu.pipeline_mode<synchronous>, transform_indices = @transform_6, window_bounds = array<i64: 1, 128>}, {pipeline_mode = #tpu.pipeline_mode<synchronous>, transform_indices = @transform_7, window_bounds = array<i64: 128, 128>}, {pipeline_mode = #tpu.pipeline_mode<synchronous>, transform_indices = @transform_8, window_bounds = array<i64: 1, 128>}, {pipeline_mode = #tpu.pipeline_mode<synchronous>, transform_indices = @transform_9, window_bounds = array<i64: 128, 128>}, {pipeline_mode = #tpu.pipeline_mode<synchronous>, transform_indices = @transform_10, window_bounds = array<i64: 1, 128>}, {pipeline_mode = #tpu.pipeline_mode<synchronous>, transform_indices = @transform_11, window_bounds = array<i64: 128, 128>}, {pipeline_mode = #tpu.pipeline_mode<synchronous>, transform_indices = @transform_12, window_bounds = array<i64: 1, 128>}, {transform_indices = @transform_13, window_bounds = array<i64: 64, 128>}]} {
    %c0 = arith.constant 0 : index
    %c0_0 = arith.constant 0 : index
    %0 = vector.load %arg1[%c0, %c0_0] : memref<64x64xf32, #tpu.memory_space<vmem>>, vector<64x64xf32>
    %1 = arith.truncf %0 : vector<64x64xf32> to vector<64x64xbf16>
    %c0_1 = arith.constant 0 : index
    %c0_2 = arith.constant 0 : index
    %2 = vector.load %arg2[%c0_1, %c0_2] : memref<64x128xbf16, #tpu.memory_space<vmem>>, vector<64x128xbf16>
    %cst = arith.constant dense<0.000000e+00> : vector<64x128xf32>
    %3 = tpu.matmul %1, %2, %cst {dimension_numbers = #tpu.dot_dimension_numbers<[1], [0], [0], [1], [0, 0, 1, 1], [], []>} : vector<64x64xbf16>, vector<64x128xbf16>, vector<64x128xf32> -> vector<64x128xf32>
    %c0_3 = arith.constant 0 : index
    %c0_4 = arith.constant 0 : index
    %4 = vector.load %arg3[%c0_3, %c0_4] : memref<1x128xf32, #tpu.memory_space<vmem>>, vector<1x128xf32>
    %5 = vector.broadcast %4 : vector<1x128xf32> to vector<64x128xf32>
    %6 = arith.addf %3, %5 : vector<64x128xf32>
    %cst_5 = arith.constant 0.000000e+00 : f32
    %7 = vector.broadcast %cst_5 : f32 to vector<64x128xf32>
    %8 = arith.maximumf %6, %7 : vector<64x128xf32>
    %9 = arith.truncf %8 : vector<64x128xf32> to vector<64x128xbf16>
    %c0_6 = arith.constant 0 : index
    %c0_7 = arith.constant 0 : index
    %10 = vector.load %arg4[%c0_6, %c0_7] : memref<128x128xbf16, #tpu.memory_space<vmem>>, vector<128x128xbf16>
    %cst_8 = arith.constant dense<0.000000e+00> : vector<64x128xf32>
    %11 = tpu.matmul %9, %10, %cst_8 {dimension_numbers = #tpu.dot_dimension_numbers<[1], [0], [0], [1], [0, 0, 1, 1], [], []>} : vector<64x128xbf16>, vector<128x128xbf16>, vector<64x128xf32> -> vector<64x128xf32>
    %c0_9 = arith.constant 0 : index
    %c0_10 = arith.constant 0 : index
    %12 = vector.load %arg5[%c0_9, %c0_10] : memref<1x128xf32, #tpu.memory_space<vmem>>, vector<1x128xf32>
    %13 = vector.broadcast %12 : vector<1x128xf32> to vector<64x128xf32>
    %14 = arith.addf %11, %13 : vector<64x128xf32>
    %cst_11 = arith.constant 0.000000e+00 : f32
    %15 = vector.broadcast %cst_11 : f32 to vector<64x128xf32>
    %16 = arith.maximumf %14, %15 : vector<64x128xf32>
    %17 = arith.truncf %16 : vector<64x128xf32> to vector<64x128xbf16>
    %c0_12 = arith.constant 0 : index
    %c0_13 = arith.constant 0 : index
    %18 = vector.load %arg6[%c0_12, %c0_13] : memref<128x128xbf16, #tpu.memory_space<vmem>>, vector<128x128xbf16>
    %cst_14 = arith.constant dense<0.000000e+00> : vector<64x128xf32>
    %19 = tpu.matmul %17, %18, %cst_14 {dimension_numbers = #tpu.dot_dimension_numbers<[1], [0], [0], [1], [0, 0, 1, 1], [], []>} : vector<64x128xbf16>, vector<128x128xbf16>, vector<64x128xf32> -> vector<64x128xf32>
    %c0_15 = arith.constant 0 : index
    %c0_16 = arith.constant 0 : index
    %20 = vector.load %arg7[%c0_15, %c0_16] : memref<1x128xf32, #tpu.memory_space<vmem>>, vector<1x128xf32>
    %21 = vector.broadcast %20 : vector<1x128xf32> to vector<64x128xf32>
    %22 = arith.addf %19, %21 : vector<64x128xf32>
    %cst_17 = arith.constant 0.000000e+00 : f32
    %23 = vector.broadcast %cst_17 : f32 to vector<64x128xf32>
    %24 = arith.maximumf %22, %23 : vector<64x128xf32>
    %25 = arith.truncf %24 : vector<64x128xf32> to vector<64x128xbf16>
    %c0_18 = arith.constant 0 : index
    %c0_19 = arith.constant 0 : index
    %26 = vector.load %arg8[%c0_18, %c0_19] : memref<128x128xbf16, #tpu.memory_space<vmem>>, vector<128x128xbf16>
    %cst_20 = arith.constant dense<0.000000e+00> : vector<64x128xf32>
    %27 = tpu.matmul %25, %26, %cst_20 {dimension_numbers = #tpu.dot_dimension_numbers<[1], [0], [0], [1], [0, 0, 1, 1], [], []>} : vector<64x128xbf16>, vector<128x128xbf16>, vector<64x128xf32> -> vector<64x128xf32>
    %c0_21 = arith.constant 0 : index
    %c0_22 = arith.constant 0 : index
    %28 = vector.load %arg9[%c0_21, %c0_22] : memref<1x128xf32, #tpu.memory_space<vmem>>, vector<1x128xf32>
    %29 = vector.broadcast %28 : vector<1x128xf32> to vector<64x128xf32>
    %30 = arith.addf %27, %29 : vector<64x128xf32>
    %cst_23 = arith.constant 0.000000e+00 : f32
    %31 = vector.broadcast %cst_23 : f32 to vector<64x128xf32>
    %32 = arith.maximumf %30, %31 : vector<64x128xf32>
    %33 = arith.truncf %32 : vector<64x128xf32> to vector<64x128xbf16>
    %c0_24 = arith.constant 0 : index
    %c0_25 = arith.constant 0 : index
    %34 = vector.load %arg10[%c0_24, %c0_25] : memref<128x128xbf16, #tpu.memory_space<vmem>>, vector<128x128xbf16>
    %cst_26 = arith.constant dense<0.000000e+00> : vector<64x128xf32>
    %35 = tpu.matmul %33, %34, %cst_26 {dimension_numbers = #tpu.dot_dimension_numbers<[1], [0], [0], [1], [0, 0, 1, 1], [], []>} : vector<64x128xbf16>, vector<128x128xbf16>, vector<64x128xf32> -> vector<64x128xf32>
    %c0_27 = arith.constant 0 : index
    %c0_28 = arith.constant 0 : index
    %36 = vector.load %arg11[%c0_27, %c0_28] : memref<1x128xf32, #tpu.memory_space<vmem>>, vector<1x128xf32>
    %37 = vector.broadcast %36 : vector<1x128xf32> to vector<64x128xf32>
    %38 = arith.addf %35, %37 : vector<64x128xf32>
    %cst_29 = arith.constant 0.000000e+00 : f32
    %39 = vector.broadcast %cst_29 : f32 to vector<64x128xf32>
    %40 = arith.maximumf %38, %39 : vector<64x128xf32>
    %41 = arith.truncf %40 : vector<64x128xf32> to vector<64x128xbf16>
    %c0_30 = arith.constant 0 : index
    %c0_31 = arith.constant 0 : index
    %42 = vector.load %arg12[%c0_30, %c0_31] : memref<128x128xbf16, #tpu.memory_space<vmem>>, vector<128x128xbf16>
    %cst_32 = arith.constant dense<0.000000e+00> : vector<64x128xf32>
    %43 = tpu.matmul %41, %42, %cst_32 {dimension_numbers = #tpu.dot_dimension_numbers<[1], [0], [0], [1], [0, 0, 1, 1], [], []>} : vector<64x128xbf16>, vector<128x128xbf16>, vector<64x128xf32> -> vector<64x128xf32>
    %c0_33 = arith.constant 0 : index
    %c0_34 = arith.constant 0 : index
    %44 = vector.load %arg13[%c0_33, %c0_34] : memref<1x128xf32, #tpu.memory_space<vmem>>, vector<1x128xf32>
    %45 = vector.broadcast %44 : vector<1x128xf32> to vector<64x128xf32>
    %46 = arith.addf %43, %45 : vector<64x128xf32>
    %c0_35 = arith.constant 0 : index
    %c0_36 = arith.constant 0 : index
    %47 = vector.load %arg14[%c0_35, %c0_36] : memref<64x128xf32, #tpu.memory_space<vmem>>, vector<64x128xf32>
    tpu.vector_store %arg14[%c0_35, %c0_36], %46 {strides = array<i32>} : memref<64x128xf32, #tpu.memory_space<vmem>>, vector<64x128xf32>,
    return
  }
  func.func @transform_0(%arg0: i32) -> (i32, i32) {
    %c0_i32 = arith.constant 0 : i32
    %c0_i32_0 = arith.constant 0 : i32
    return %arg0, %c0_i32 : i32, i32
  }
  func.func @transform_1(%arg0: i32) -> (i32, i32) {
    %c0_i32 = arith.constant 0 : i32
    %c0_i32_0 = arith.constant 0 : i32
    %c0_i32_1 = arith.constant 0 : i32
    return %c0_i32, %c0_i32_0 : i32, i32
  }
  func.func @transform_2(%arg0: i32) -> (i32, i32) {
    %c0_i32 = arith.constant 0 : i32
    %c0_i32_0 = arith.constant 0 : i32
    %c0_i32_1 = arith.constant 0 : i32
    return %c0_i32, %c0_i32_0 : i32, i32
  }
  func.func @transform_3(%arg0: i32) -> (i32, i32) {
    %c0_i32 = arith.constant 0 : i32
    %c0_i32_0 = arith.constant 0 : i32
    %c0_i32_1 = arith.constant 0 : i32
    return %c0_i32, %c0_i32_0 : i32, i32
  }
  func.func @transform_4(%arg0: i32) -> (i32, i32) {
    %c0_i32 = arith.constant 0 : i32
    %c0_i32_0 = arith.constant 0 : i32
    %c0_i32_1 = arith.constant 0 : i32
    return %c0_i32, %c0_i32_0 : i32, i32
  }
  func.func @transform_5(%arg0: i32) -> (i32, i32) {
    %c0_i32 = arith.constant 0 : i32
    %c0_i32_0 = arith.constant 0 : i32
    %c0_i32_1 = arith.constant 0 : i32
    return %c0_i32, %c0_i32_0 : i32, i32
  }
  func.func @transform_6(%arg0: i32) -> (i32, i32) {
    %c0_i32 = arith.constant 0 : i32
    %c0_i32_0 = arith.constant 0 : i32
    %c0_i32_1 = arith.constant 0 : i32
    return %c0_i32, %c0_i32_0 : i32, i32
  }
  func.func @transform_7(%arg0: i32) -> (i32, i32) {
    %c0_i32 = arith.constant 0 : i32
    %c0_i32_0 = arith.constant 0 : i32
    %c0_i32_1 = arith.constant 0 : i32
    return %c0_i32, %c0_i32_0 : i32, i32
  }
  func.func @transform_8(%arg0: i32) -> (i32, i32) {
    %c0_i32 = arith.constant 0 : i32
    %c0_i32_0 = arith.constant 0 : i32
    %c0_i32_1 = arith.constant 0 : i32
    return %c0_i32, %c0_i32_0 : i32, i32
  }
  func.func @transform_9(%arg0: i32) -> (i32, i32) {
    %c0_i32 = arith.constant 0 : i32
    %c0_i32_0 = arith.constant 0 : i32
    %c0_i32_1 = arith.constant 0 : i32
    return %c0_i32, %c0_i32_0 : i32, i32
  }
  func.func @transform_10(%arg0: i32) -> (i32, i32) {
    %c0_i32 = arith.constant 0 : i32
    %c0_i32_0 = arith.constant 0 : i32
    %c0_i32_1 = arith.constant 0 : i32
    return %c0_i32, %c0_i32_0 : i32, i32
  }
  func.func @transform_11(%arg0: i32) -> (i32, i32) {
    %c0_i32 = arith.constant 0 : i32
    %c0_i32_0 = arith.constant 0 : i32
    %c0_i32_1 = arith.constant 0 : i32
    return %c0_i32, %c0_i32_0 : i32, i32
  }
  func.func @transform_12(%arg0: i32) -> (i32, i32) {
    %c0_i32 = arith.constant 0 : i32
    %c0_i32_0 = arith.constant 0 : i32
    %c0_i32_1 = arith.constant 0 : i32
    return %c0_i32, %c0_i32_0 : i32, i32
  }
  func.func @transform_13(%arg0: i32) -> (i32, i32) {
    %c0_i32 = arith.constant 0 : i32
    %c0_i32_0 = arith.constant 0 : i32
    return %arg0, %c0_i32 : i32, i32
  }
}

</mosaic_0001>

<bundles_post_ra>
// kernel: autoencoder_forward.1
= control target key start
LH: loop header
LB: loop body
LE: loop exit
PB: predicated region body
PF: predicated region fallthrough
CT: control target
= control target key end

     0   :  { %18 = vsyncpa [#allocation3], 0  ;;  %s1769_s0 = inlined_call_operand.hbm [shape: f32[64,64], index: 0, kind: input, shape index: {}]   ;;  %s1770_s1 = inlined_call_operand.hbm [shape: bf16[64,128], index: 1, kind: input, shape index: {}]   ;;  %s1771_s2 = inlined_call_operand.vmem [shape: f32[1,128], index: 2, kind: input, shape index: {}]   ;;  %s1772_s3 = inlined_call_operand.hbm [shape: bf16[128,128], index: 3, kind: input, shape index: {}]   ;;  %s1773_s4 = inlined_call_operand.vmem [shape: f32[1,128], index: 4, kind: input, shape index: {}]   ;;  %s1774_s5 = inlined_call_operand.hbm [shape: bf16[128,128], index: 5, kind: input, shape index: {}]   ;;  %s1775_s6 = inlined_call_operand.vmem [shape: f32[1,128], index: 6, kind: input, shape index: {}]   ;;  %s1776_s7 = inlined_call_operand.hbm [shape: bf16[128,128], index: 7, kind: input, shape index: {}]   ;;  %s1777_s8 = inlined_call_operand.vmem [shape: f32[1,128], index: 8, kind: input, shape index: {}]   ;;  %s1778_s9 = inlined_call_operand.hbm [shape: bf16[128,128], index: 9, kind: input, shape index: {}]   ;;  %s1779_s10 = inlined_call_operand.vmem [shape: f32[1,128], index: 10, kind: input, shape index: {}]   ;;  %s1780_s11 = inlined_call_operand.hbm [shape: bf16[128,128], index: 11, kind: input, shape index: {}]   ;;  %s1781_s12 = inlined_call_operand.vmem [shape: f32[1,128], index: 12, kind: input, shape index: {}]   ;;  %s1782_s13 = inlined_call_operand.hbm [shape: f32[64,128], index: 13, kind: output, shape index: {}]  }
   0x1   :  { %19 = vsyncpa [#allocation6], 0 }
   0x2   :  { %20 = vsyncpa [#allocation9], 0 }
   0x3   :  { %21 = vsyncpa [#allocation12], 0 }
   0x4   :  { %22 = vsyncpa [#allocation4], 0  ;;  %s1538_s25 = smov [#allocation5]   ;;  %s1352_s29 = scalar_lea.hbm %s1770_s1, 512 }
   0x5   :  { %s40_s26 = sshll.u32 %s1538_s25, 4  ;;  %p1353_p0 = scmp.ne.s32.totalorder %s1770_s1, %s1352_s29  ;;  %s41_s26 = int_to_ptr.vmem [resolvable:$true] %s40_s26 }
   0x6   :  { %p1356_p1 = scmp.lt.u32.totalorder %s1352_s29, %s1770_s1 }
   0x8   :  { %p1358_p2 = pnand %p1356_p1, %p1353_p0 }
   0xa   :  { %1361 = shalt.err (!%p1358_p2)
}
   0xb   :  { %s1362_s17 = scalar_lea.vmem %s41_s26, 512  ;;  %p1367_p4 = scmp.lt.s32.totalorder %s41_s26, %s41_s26 }
   0xc   :  { %p1363_p3 = scmp.ne.s32.totalorder %s41_s26, %s1362_s17  ;;  %p1368_p5 = scmp.lt.s32.totalorder %s1362_s17, %s1362_s17 }
   0xe   :  { %p1369_p6 = por %p1368_p5, %p1367_p4 }
  0x10   :  { %p1370_p7 = pnand %p1369_p6, %p1363_p3 }
  0x12   :  { %1373 = shalt.err (!%p1370_p7)
}
  0x13   :  { %s1539_s18 = smov 64   ;;  %s1540_s19 = smov 4  }
  0x14   :  { %46 = dma.hbm_to_vmem [thread:$0]  %s1770_s1, 512, %s41_s26, [#allocation6], %s1539_s18, %s1539_s18, %s1540_s19  }
  0x15   :  { %s1541_s22 = smov [#allocation8]   ;;  %s1542_s24 = smov [#allocation11]  }
  0x16   :  { %s68_s23 = sshll.u32 %s1541_s22, 4  ;;  %s96_s25 = sshll.u32 %s1542_s24, 4  ;;  %s69_s23 = int_to_ptr.vmem [resolvable:$true] %s68_s23  ;;  %s97_s25 = int_to_ptr.vmem [resolvable:$true] %s96_s25 }
  0x17   :  { %s1374_s29 = scalar_lea.hbm %s1774_s5, 1024 }
  0x18   :  { %p1375_p8 = scmp.ne.s32.totalorder %s1774_s5, %s1374_s29  ;;  %p1378_p9 = scmp.lt.u32.totalorder %s1374_s29, %s1774_s5 }
  0x1a   :  { %p1380_p10 = pnand %p1378_p9, %p1375_p8 }
  0x1c   :  { %1383 = shalt.err (!%p1380_p10)
}
  0x1d   :  { %s1384_s1 = scalar_lea.vmem %s69_s23, 1024  ;;  %p1389_p12 = scmp.lt.s32.totalorder %s69_s23, %s69_s23 }
  0x1e   :  { %p1385_p11 = scmp.ne.s32.totalorder %s69_s23, %s1384_s1  ;;  %p1390_p13 = scmp.lt.s32.totalorder %s1384_s1, %s1384_s1 }
  0x20   :  { %p1391_p0 = por %p1390_p13, %p1389_p12 }
  0x22   :  { %p1392_p1 = pnand %p1391_p0, %p1385_p11 }
  0x24   :  { %1395 = shalt.err (!%p1392_p1)
}
  0x25   :  { %74 = dma.hbm_to_vmem [thread:$0]  %s1774_s5, 1024, %s69_s23, [#allocation9], %s1539_s18, %s1539_s18, %s1540_s19  }
  0x26   :  { %s1396_s22 = scalar_lea.hbm %s1778_s9, 1024 }
  0x27   :  { %p1397_p2 = scmp.ne.s32.totalorder %s1778_s9, %s1396_s22  ;;  %p1400_p3 = scmp.lt.u32.totalorder %s1396_s22, %s1778_s9 }
  0x29   :  { %p1402_p4 = pnand %p1400_p3, %p1397_p2 }
  0x2b   :  { %1405 = shalt.err (!%p1402_p4)
}
  0x2c   :  { %s1406_s30 = scalar_lea.vmem %s97_s25, 1024  ;;  %p1411_p6 = scmp.lt.s32.totalorder %s97_s25, %s97_s25 }
  0x2d   :  { %p1407_p5 = scmp.ne.s32.totalorder %s97_s25, %s1406_s30  ;;  %p1412_p7 = scmp.lt.s32.totalorder %s1406_s30, %s1406_s30 }
  0x2f   :  { %p1413_p8 = por %p1412_p7, %p1411_p6 }
  0x31   :  { %p1414_p9 = pnand %p1413_p8, %p1407_p5 }
  0x33   :  { %1417 = shalt.err (!%p1414_p9)
}
  0x34   :  { %102 = dma.hbm_to_vmem [thread:$0]  %s1778_s9, 1024, %s97_s25, [#allocation12], %s1539_s18, %s1539_s18, %s1540_s19  }
  0x35   :  { %s1543_s14 = smov [#allocation2]   ;;  %s1418_s26 = scalar_lea.hbm %s1769_s0, 1024 }
  0x36   :  { %s28_s15 = sshll.u32 %s1543_s14, 4  ;;  %p1419_p10 = scmp.ne.s32.totalorder %s1769_s0, %s1418_s26  ;;  %s29_s15 = int_to_ptr.vmem [resolvable:$true] %s28_s15 }
  0x37   :  { %p1422_p11 = scmp.lt.u32.totalorder %s1418_s26, %s1769_s0 }
  0x39   :  { %p1424_p12 = pnand %p1422_p11, %p1419_p10 }
  0x3b   :  { %1427 = shalt.err (!%p1424_p12)
}
  0x3c   :  { %s1428_s24 = scalar_lea.vmem %s29_s15, 1024  ;;  %p1433_p0 = scmp.lt.s32.totalorder %s29_s15, %s29_s15 }
  0x3d   :  { %p1429_p13 = scmp.ne.s32.totalorder %s29_s15, %s1428_s24  ;;  %p1434_p1 = scmp.lt.s32.totalorder %s1428_s24, %s1428_s24 }
  0x3f   :  { %p1435_p2 = por %p1434_p1, %p1433_p0 }
  0x41   :  { %p1436_p3 = pnand %p1435_p2, %p1429_p13 }
  0x43   :  { %1439 = shalt.err (!%p1436_p3)
}
  0x44   :  { %s1544_s9 = smov 128   ;;  %s1545_s25 = smov 8  }
  0x45   :  { %34 = dma.hbm_to_vmem [thread:$0]  %s1769_s0, 1024, %s29_s15, [#allocation3], %s1544_s9, %s1544_s9, %s1545_s25  }
  0x46   :  { %s1546_s29 = smov [#allocation7]   ;;  %s1547_s5 = smov [#allocation10]  }
  0x47   :  { %s54_s30 = sshll.u32 %s1546_s29, 4  ;;  %s82_s23 = sshll.u32 %s1547_s5, 4  ;;  %s55_s30 = int_to_ptr.vmem [resolvable:$true] %s54_s30  ;;  %s1680_s23 = int_to_ptr.vmem [resolvable:$true] %s82_s23 }
  0x48   :  { %s1440_s1 = scalar_lea.hbm %s1772_s3, 1024 }
  0x49   :  { %p1441_p4 = scmp.ne.s32.totalorder %s1772_s3, %s1440_s1  ;;  %p1444_p5 = scmp.lt.u32.totalorder %s1440_s1, %s1772_s3 }
  0x4b   :  { %p1446_p6 = pnand %p1444_p5, %p1441_p4 }
  0x4d   :  { %1449 = shalt.err (!%p1446_p6)
}
  0x4e   :  { %s1450_s0 = scalar_lea.vmem %s55_s30, 1024  ;;  %p1455_p8 = scmp.lt.s32.totalorder %s55_s30, %s55_s30 }
  0x4f   :  { %p1451_p7 = scmp.ne.s32.totalorder %s55_s30, %s1450_s0  ;;  %p1456_p9 = scmp.lt.s32.totalorder %s1450_s0, %s1450_s0 }
  0x51   :  { %p1457_p10 = por %p1456_p9, %p1455_p8 }
  0x53   :  { %p1458_p11 = pnand %p1457_p10, %p1451_p7 }
  0x55   :  { %1461 = shalt.err (!%p1458_p11)
}
  0x56   :  { %60 = dma.hbm_to_vmem [thread:$0]  %s1772_s3, 1024, %s55_s30, [#allocation6], %s1539_s18, %s1539_s18, %s1540_s19  }
  0x57   :  { %s1462_s28 = scalar_lea.hbm %s1776_s7, 1024 }
  0x58   :  { %p1463_p12 = scmp.ne.s32.totalorder %s1776_s7, %s1462_s28  ;;  %p1466_p13 = scmp.lt.u32.totalorder %s1462_s28, %s1776_s7 }
  0x5a   :  { %p1468_p0 = pnand %p1466_p13, %p1463_p12 }
  0x5c   :  { %1471 = shalt.err (!%p1468_p0)
}
  0x5d   :  { %s1472_s1 = scalar_lea.vmem %s1680_s23, 1024  ;;  %p1477_p2 = scmp.lt.s32.totalorder %s1680_s23, %s1680_s23 }
  0x5e   :  { %p1473_p1 = scmp.ne.s32.totalorder %s1680_s23, %s1472_s1  ;;  %p1478_p3 = scmp.lt.s32.totalorder %s1472_s1, %s1472_s1 }
  0x60   :  { %p1479_p4 = por %p1478_p3, %p1477_p2 }
  0x62   :  { %p1480_p5 = pnand %p1479_p4, %p1473_p1 }
  0x64   :  { %1483 = shalt.err (!%p1480_p5)
}
  0x65   :  { %88 = dma.hbm_to_vmem [thread:$0]  %s1776_s7, 1024, %s1680_s23, [#allocation9], %s1539_s18, %s1539_s18, %s1540_s19  }
  0x66   :  { %s1548_s26 = smov [#allocation13]   ;;  %s1484_s0 = scalar_lea.hbm %s1780_s11, 1024 }
  0x67   :  { %s110_s17 = sshll.u32 %s1548_s26, 4  ;;  %p1485_p6 = scmp.ne.s32.totalorder %s1780_s11, %s1484_s0  ;;  %s111_s17 = int_to_ptr.vmem [resolvable:$true] %s110_s17 }
  0x68   :  { %p1488_p7 = scmp.lt.u32.totalorder %s1484_s0, %s1780_s11 }
  0x6a   :  { %p1490_p8 = pnand %p1488_p7, %p1485_p6 }
  0x6c   :  { %1493 = shalt.err (!%p1490_p8)
}
  0x6d   :  { %s1494_s28 = scalar_lea.vmem %s111_s17, 1024  ;;  %p1499_p10 = scmp.lt.s32.totalorder %s111_s17, %s111_s17 }
  0x6e   :  { %p1495_p9 = scmp.ne.s32.totalorder %s111_s17, %s1494_s28  ;;  %p1500_p11 = scmp.lt.s32.totalorder %s1494_s28, %s1494_s28 }
  0x70   :  { %p1501_p12 = por %p1500_p11, %p1499_p10 }
  0x72   :  { %p1502_p13 = pnand %p1501_p12, %p1495_p9 }
  0x74   :  { %1505 = shalt.err (!%p1502_p13)
}
  0x75   :  { %116 = dma.hbm_to_vmem [thread:$0]  %s1780_s11, 1024, %s111_s17, [#allocation12], %s1539_s18, %s1539_s18, %s1540_s19  }
  0x76   :  { %1528 = dma.done.wait [#allocation3], 1024  }
  0x77   :  { %1529 = vsyncadd [#allocation3], 4294966272 }
  0x78   :  { %1530 = dma.done.wait [#allocation6], 1536  }
  0x79   :  { %1531 = vsyncadd [#allocation6], 4294965760 }
  0x7a   :  { %1532 = dma.done.wait [#allocation9], 2048  }
  0x7b   :  { %1533 = vsyncadd [#allocation9], 4294965248 }
  0x7c   :  { %1534 = dma.done.wait [#allocation12], 2048  }
  0x7d   :  { %1535 = vsyncadd [#allocation12], 4294965248  ;;  %v1308_v0 = vld [vmem:[#allocation5] sm:$0xff]   ;;  %v1309_v1 = vld [vmem:[#allocation5 + $0x8] sm:$0xff]   ;;  %vm192_vm0 = vcmask 523264   ;;  %s1549_s1 = smov [#allocation14]  }
  0x7e   :  { %1160 = vmatprep.subr.bf16.mxu0 %v1308_v0  ;;  %v1310_v2 = vld [vmem:[#allocation5 + $0x10] sm:$0xff]   ;;  %v141_v3 = vld [vmem:[#allocation2] sm:$0xff]  ;;  %v142_v4 = vld [vmem:[#allocation2 + $0x8] sm:$0xff]  ;;  %s1023_s3 = sshll.u32 %s1549_s1, 4  ;;  %s1024_s3 = int_to_ptr.vmem [resolvable:$true] %s1023_s3 }
  0x7f   :  { %1161 = vmatpush3.bf16.msra.mxu0 %v1308_v0  ;;  %v149_v5 = vpack.c.bf16 %v142_v4, %v141_v3  ;;  %v1311_v6 = vld [vmem:[#allocation5 + $0x18] sm:$0xff]   ;;  %v1312_v7 = vld [vmem:[#allocation7] sm:$0xff]   ;;  %v1313_v8 = vld [vmem:[#allocation7 + $0x8] sm:$0xff]   ;;  %p1511_p1 = scmp.lt.s32.totalorder %s1024_s3, %s1024_s3 }
  0x80   :  { %1162 = vmatprep.subr.bf16.mxu0 %v1309_v1  ;;  %v143_v9 = vld [vmem:[#allocation2 + $0x10] sm:$0xff]  ;;  %v144_v10 = vld [vmem:[#allocation2 + $0x18] sm:$0xff]  ;;  %1176 = vmatprep.subr.bf16.mxu1 %v1312_v7  ;;  %v145_v11 = vld [vmem:[#allocation2 + $0x20] sm:$0xff] }
  0x81   :  { %1168 = vmatprep.mubr.msk.bf16.mxu0 %vm192_vm0, %v149_v5  ;;  %1177 = vmatpush3.bf16.msra.mxu1 %v1312_v7  ;;  %v1314_v12 = vld [vmem:[#allocation7 + $0x10] sm:$0xff]   ;;  %v146_v13 = vld [vmem:[#allocation2 + $0x28] sm:$0xff]  ;;  %v1315_v14 = vld [vmem:[#allocation7 + $0x18] sm:$0xff]   ;;  %v150_v15 = vpack.c.bf16 %v144_v10, %v143_v9 }
  0x82   :  { %1178 = vmatprep.subr.bf16.mxu1 %v1313_v8  ;;  %v151_v16 = vpack.c.bf16 %v146_v13, %v145_v11  ;;  %v147_v17 = vld [vmem:[#allocation2 + $0x30] sm:$0xff]  ;;  %v148_v18 = vld [vmem:[#allocation2 + $0x38] sm:$0xff]  ;;  %v1316_v19 = vld [vmem:[#allocation7 + $0x20] sm:$0xff]  }
  0x83   :  { %1163 = vmatpush3.bf16.msra.mxu0 %v1309_v1  ;;  %v1317_v20 = vld [vmem:[#allocation7 + $0x28] sm:$0xff]   ;;  %v152_v21 = vpack.c.bf16 %v148_v18, %v147_v17  ;;  %v1318_v22 = vld [vmem:[#allocation7 + $0x30] sm:$0xff]   ;;  %v1319_v23 = vld [vmem:[#allocation7 + $0x38] sm:$0xff]  }
  0x84   :  { %1164 = vmatprep.subr.bf16.mxu0 %v1310_v2  ;;  %v1320_v24 = vld [vmem:[#allocation8] sm:$0xff]   ;;  %v1321_v25 = vld [vmem:[#allocation8 + $0x8] sm:$0xff]   ;;  %v1322_v26 = vld [vmem:[#allocation8 + $0x10] sm:$0xff]  }
  0x85   :  { %1179 = vmatpush3.bf16.msra.mxu1 %v1313_v8  ;;  %v1323_v27 = vld [vmem:[#allocation8 + $0x18] sm:$0xff]   ;;  %v1324_v28 = vld [vmem:[#allocation8 + $0x20] sm:$0xff]   ;;  %v1325_v29 = vld [vmem:[#allocation8 + $0x28] sm:$0xff]  }
  0x86   :  { %1180 = vmatprep.subr.bf16.mxu1 %v1314_v12  ;;  %v1038_v30 = vld [vmem:[%s1771_s2] ss:$0 sm:$0xff]  ;;  %v1326_v59 = vld [vmem:[#allocation8 + $0x30] sm:$0xff]   ;;  %v1327_v60 = vld [vmem:[#allocation8 + $0x38] sm:$0xff]  }
  0x87   :  { %1165 = vmatpush3.bf16.msra.mxu0 %v1310_v2  ;;  %v1328_v61 = vld [vmem:[#allocation10] sm:$0xff]   ;;  %v1329_v62 = vld [vmem:[#allocation10 + $0x8] sm:$0xff]   ;;  %v1330_v63 = vld [vmem:[#allocation10 + $0x10] sm:$0xff]  }
  0x88   :  { %1166 = vmatprep.subr.bf16.mxu0 %v1311_v6  ;;  %v1331_v0 = vld [vmem:[#allocation10 + $0x18] sm:$0xff]   ;;  %v1332_v1 = vld [vmem:[#allocation10 + $0x20] sm:$0xff]   ;;  %v1333_v2 = vld [vmem:[#allocation10 + $0x28] sm:$0xff]  }
  0x89   :  { %1181 = vmatpush3.bf16.msra.mxu1 %v1314_v12  ;;  %v1047_v3 = vld [vmem:[%s1773_s4] ss:$0 sm:$0xff] }
  0x8a   :  { %1182 = vmatprep.subr.bf16.mxu1 %v1315_v14 }
  0x8b   :  { %1167 = vmatpush3.bf16.msra.mxu0 %v1311_v6 }
  0x8c   :  { %1200 = vmatprep.subr.bf16.mxu0 %v1320_v24 }
  0x8d   :  { %1183 = vmatpush3.bf16.msra.mxu1 %v1315_v14 }
  0x8e   :  { %1169 = vmatmul.mubr.msk.bf16.vlgmr.msra.gmra.mrb[0].mxu0 %vm192_vm0, %v150_v15  ;;  %1184 = vmatprep.subr.bf16.mxu1 %v1316_v19 }
  0x8f   :  { %1172 = vmatprep.mubr.msk.bf16.mxu0 %vm192_vm0, %v151_v16  ;;  %1201 = vmatpush3.bf16.msra.mxu0 %v1320_v24 }
  0x90   :  { %1202 = vmatprep.subr.bf16.mxu0 %v1321_v25 }
  0x91   :  { %1185 = vmatpush3.bf16.msra.mxu1 %v1316_v19 }
  0x92   :  { %1186 = vmatprep.subr.bf16.mxu1 %v1317_v20 }
  0x93   :  { %1203 = vmatpush3.bf16.msra.mxu0 %v1321_v25 }
  0x94   :  { %1204 = vmatprep.subr.bf16.mxu0 %v1322_v26 }
  0x95   :  { %1187 = vmatpush3.bf16.msra.mxu1 %v1317_v20 }
  0x96   :  { %1173 = vmatmul.mubr.msk.bf16.gmra.mrb[4].mxu0 %vm192_vm0, %v152_v21  ;;  %1188 = vmatprep.subr.bf16.mxu1 %v1318_v22 }
  0x97   :  { %1205 = vmatpush3.bf16.msra.mxu0 %v1322_v26 }
  0x98   :  { %1206 = vmatprep.subr.bf16.mxu0 %v1323_v27 }
  0x99   :  { %1189 = vmatpush3.bf16.msra.mxu1 %v1318_v22 }
  0x9a   :  { %1190 = vmatprep.subr.bf16.mxu1 %v1319_v23 }
  0x9b   :  { %1207 = vmatpush3.bf16.msra.mxu0 %v1323_v27 }
  0x9c   :  { %1208 = vmatprep.subr.bf16.mxu0 %v1324_v28 }
  0x9d   :  { %1191 = vmatpush3.bf16.msra.mxu1 %v1319_v23 }
  0x9e   :  { %1224 = vmatprep.subr.bf16.mxu1 %v1328_v61 }
  0x9f   :  { %1209 = vmatpush3.bf16.msra.mxu0 %v1324_v28 }
  0xa0   :  { %1210 = vmatprep.subr.bf16.mxu0 %v1325_v29 }
  0xa3   :  { %1211 = vmatpush3.bf16.msra.mxu0 %v1325_v29 }
  0xa4   :  { %1212 = vmatprep.subr.bf16.mxu0 %v1326_v59 }
  0xa7   :  { %1213 = vmatpush3.bf16.msra.mxu0 %v1326_v59 }
  0xa8   :  { %1214 = vmatprep.subr.bf16.mxu0 %v1327_v60 }
  0xab   :  { %1215 = vmatpush3.bf16.msra.mxu0 %v1327_v60 }
 0x161   :  { %v1170_v31 = vpop.f32.mrb[0].mxu0 }
 0x162   :  { %v248_v32 = vadd.f32 %v1170_v31, %v1038_v30  ;;  %v239_v33 = vpop.f32.mrb[1].mxu0 }
 0x163   :  { %v240_v34 = vadd.f32 %v1038_v30, %v239_v33  ;;  %v1171_v35 = vpop.f32.mrb[2].mxu0  ;;  %v1335_v33 = vld [vmem:[#allocation10 + $0x38] sm:$0xff]  }
 0x164   :  { %v251_v36 = vadd.f32 %v1171_v35, %v1038_v30  ;;  %v242_v37 = vpop.f32.mrb[3].mxu0  ;;  %v272_v39 = vmax.f32 %v248_v32, 0.0  ;;  %v1334_v32 = vld [vmem:[#allocation10 + $0x30] sm:$0xff]   ;;  %v1337_v35 = vld [vmem:[#allocation11 + $0x8] sm:$0xff]  }
 0x165   :  { %v243_v38 = vadd.f32 %v1038_v30, %v242_v37  ;;  %v270_v41 = vmax.f32 %v240_v34, 0.0  ;;  %v1336_v34 = vld [vmem:[#allocation11] sm:$0xff]   ;;  %v1339_v37 = vld [vmem:[#allocation11 + $0x18] sm:$0xff]  }
 0x166   :  { %v273_v40 = vmax.f32 %v251_v36, 0.0  ;;  %1248 = vmatprep.subr.bf16.mxu0 %v1336_v34  ;;  %v1338_v36 = vld [vmem:[#allocation11 + $0x10] sm:$0xff]  }
 0x167   :  { %v271_v42 = vmax.f32 %v243_v38, 0.0  ;;  %v1340_v38 = vld [vmem:[#allocation11 + $0x20] sm:$0xff]  }
 0x168   :  { %v279_v43 = vpack.c.bf16 %v273_v40, %v272_v39  ;;  %v1341_v39 = vld [vmem:[#allocation11 + $0x28] sm:$0xff]   ;;  %v1056_v40 = vld [vmem:[%s1775_s6] ss:$0 sm:$0xff] }
 0x169   :  { %v1174_v44 = vpop.f32.mrb[4].mxu0  ;;  %v278_v45 = vpack.c.bf16 %v271_v42, %v270_v41 }
 0x16a   :  { %v264_v46 = vadd.f32 %v1174_v44, %v1038_v30  ;;  %v255_v47 = vpop.f32.mrb[5].mxu0 }
 0x16b   :  { %v256_v48 = vadd.f32 %v1038_v30, %v255_v47  ;;  %v1175_v49 = vpop.f32.mrb[6].mxu0  ;;  %1192 = vmatprep.mubr.bf16.mxu1 %v278_v45 }
 0x16c   :  { %v267_v50 = vadd.f32 %v1175_v49, %v1038_v30  ;;  %v258_v51 = vpop.f32.mrb[7].mxu0  ;;  %1193 = vmatmul.mubr.bf16.vlgmr.msra.gmra.mrb[0].mxu1 %v279_v43  ;;  %v276_v53 = vmax.f32 %v264_v46, 0.0 }
 0x16d   :  { %v259_v52 = vadd.f32 %v1038_v30, %v258_v51  ;;  %v274_v55 = vmax.f32 %v256_v48, 0.0  ;;  %1225 = vmatpush3.bf16.msra.mxu1 %v1328_v61 }
 0x16e   :  { %v277_v54 = vmax.f32 %v267_v50, 0.0  ;;  %1226 = vmatprep.subr.bf16.mxu1 %v1329_v62 }
 0x16f   :  { %v275_v56 = vmax.f32 %v259_v52, 0.0 }
 0x170   :  { %v281_v57 = vpack.c.bf16 %v277_v54, %v276_v53 }
 0x171   :  { %v280_v58 = vpack.c.bf16 %v275_v56, %v274_v55  ;;  %1227 = vmatpush3.bf16.msra.mxu1 %v1329_v62 }
 0x172   :  { %1228 = vmatprep.subr.bf16.mxu1 %v1330_v63 }
 0x173   :  { %1196 = vmatprep.mubr.bf16.mxu1 %v280_v58 }
 0x174   :  { %1197 = vmatmul.mubr.bf16.gmra.mrb[4].mxu1 %v281_v57 }
 0x175   :  { %1229 = vmatpush3.bf16.msra.mxu1 %v1330_v63 }
 0x176   :  { %1230 = vmatprep.subr.bf16.mxu1 %v1331_v0 }
 0x179   :  { %1231 = vmatpush3.bf16.msra.mxu1 %v1331_v0 }
 0x17a   :  { %1232 = vmatprep.subr.bf16.mxu1 %v1332_v1 }
 0x17d   :  { %1233 = vmatpush3.bf16.msra.mxu1 %v1332_v1 }
 0x17e   :  { %1234 = vmatprep.subr.bf16.mxu1 %v1333_v2 }
 0x181   :  { %1235 = vmatpush3.bf16.msra.mxu1 %v1333_v2 }
 0x182   :  { %1236 = vmatprep.subr.bf16.mxu1 %v1334_v32 }
 0x185   :  { %1237 = vmatpush3.bf16.msra.mxu1 %v1334_v32 }
 0x186   :  { %1238 = vmatprep.subr.bf16.mxu1 %v1335_v33 }
 0x189   :  { %1239 = vmatpush3.bf16.msra.mxu1 %v1335_v33 }
 0x23f   :  { %v1194_v4 = vpop.f32.mrb[0].mxu1 }
 0x240   :  { %v396_v5 = vadd.f32 %v1194_v4, %v1047_v3  ;;  %v387_v6 = vpop.f32.mrb[1].mxu1 }
 0x241   :  { %v388_v7 = vadd.f32 %v1047_v3, %v387_v6  ;;  %v1195_v8 = vpop.f32.mrb[2].mxu1  ;;  %v1343_v6 = vld [vmem:[#allocation11 + $0x38] sm:$0xff]  }
 0x242   :  { %v399_v9 = vadd.f32 %v1195_v8, %v1047_v3  ;;  %v390_v10 = vpop.f32.mrb[3].mxu1  ;;  %v420_v12 = vmax.f32 %v396_v5, 0.0  ;;  %v1342_v5 = vld [vmem:[#allocation11 + $0x30] sm:$0xff]   ;;  %v1345_v8 = vld [vmem:[#allocation13 + $0x8] sm:$0xff]  }
 0x243   :  { %v391_v11 = vadd.f32 %v1047_v3, %v390_v10  ;;  %v418_v14 = vmax.f32 %v388_v7, 0.0  ;;  %v1344_v7 = vld [vmem:[#allocation13] sm:$0xff]   ;;  %v1347_v10 = vld [vmem:[#allocation13 + $0x18] sm:$0xff]  }
 0x244   :  { %v421_v13 = vmax.f32 %v399_v9, 0.0  ;;  %1272 = vmatprep.subr.bf16.mxu1 %v1344_v7  ;;  %v1346_v9 = vld [vmem:[#allocation13 + $0x10] sm:$0xff]  }
 0x245   :  { %v419_v15 = vmax.f32 %v391_v11, 0.0  ;;  %v1348_v11 = vld [vmem:[#allocation13 + $0x20] sm:$0xff]  }
 0x246   :  { %v427_v16 = vpack.c.bf16 %v421_v13, %v420_v12  ;;  %v1349_v12 = vld [vmem:[#allocation13 + $0x28] sm:$0xff]   ;;  %v1065_v13 = vld [vmem:[%s1777_s8] ss:$0 sm:$0xff] }
 0x247   :  { %v426_v17 = vpack.c.bf16 %v419_v15, %v418_v14  ;;  %v1198_v18 = vpop.f32.mrb[4].mxu1 }
 0x248   :  { %v412_v19 = vadd.f32 %v1198_v18, %v1047_v3  ;;  %v403_v20 = vpop.f32.mrb[5].mxu1 }
 0x249   :  { %v404_v21 = vadd.f32 %v1047_v3, %v403_v20  ;;  %v1199_v22 = vpop.f32.mrb[6].mxu1  ;;  %1216 = vmatprep.mubr.bf16.mxu0 %v426_v17 }
 0x24a   :  { %v415_v23 = vadd.f32 %v1199_v22, %v1047_v3  ;;  %v406_v24 = vpop.f32.mrb[7].mxu1  ;;  %1217 = vmatmul.mubr.bf16.vlgmr.msra.gmra.mrb[8].mxu0 %v427_v16  ;;  %v424_v26 = vmax.f32 %v412_v19, 0.0 }
 0x24b   :  { %v407_v25 = vadd.f32 %v1047_v3, %v406_v24  ;;  %v422_v28 = vmax.f32 %v404_v21, 0.0  ;;  %1249 = vmatpush3.bf16.msra.mxu0 %v1336_v34 }
 0x24c   :  { %v425_v27 = vmax.f32 %v415_v23, 0.0  ;;  %1250 = vmatprep.subr.bf16.mxu0 %v1337_v35 }
 0x24d   :  { %v423_v29 = vmax.f32 %v407_v25, 0.0 }
 0x24e   :  { %v429_v30 = vpack.c.bf16 %v425_v27, %v424_v26 }
 0x24f   :  { %v428_v31 = vpack.c.bf16 %v423_v29, %v422_v28  ;;  %1251 = vmatpush3.bf16.msra.mxu0 %v1337_v35 }
 0x250   :  { %1252 = vmatprep.subr.bf16.mxu0 %v1338_v36 }
 0x251   :  { %1220 = vmatprep.mubr.bf16.mxu0 %v428_v31 }
 0x252   :  { %1221 = vmatmul.mubr.bf16.gmra.mrb[12].mxu0 %v429_v30 }
 0x253   :  { %1253 = vmatpush3.bf16.msra.mxu0 %v1338_v36 }
 0x254   :  { %1254 = vmatprep.subr.bf16.mxu0 %v1339_v37 }
 0x257   :  { %1255 = vmatpush3.bf16.msra.mxu0 %v1339_v37 }
 0x258   :  { %1256 = vmatprep.subr.bf16.mxu0 %v1340_v38 }
 0x25b   :  { %1257 = vmatpush3.bf16.msra.mxu0 %v1340_v38 }
 0x25c   :  { %1258 = vmatprep.subr.bf16.mxu0 %v1341_v39 }
 0x25f   :  { %1259 = vmatpush3.bf16.msra.mxu0 %v1341_v39 }
 0x260   :  { %1260 = vmatprep.subr.bf16.mxu0 %v1342_v5 }
 0x263   :  { %1261 = vmatpush3.bf16.msra.mxu0 %v1342_v5 }
 0x264   :  { %1262 = vmatprep.subr.bf16.mxu0 %v1343_v6 }
 0x267   :  { %1263 = vmatpush3.bf16.msra.mxu0 %v1343_v6 }
 0x31d   :  { %v1218_v41 = vpop.f32.mrb[8].mxu0 }
 0x31e   :  { %v544_v42 = vadd.f32 %v1218_v41, %v1056_v40  ;;  %v535_v43 = vpop.f32.mrb[9].mxu0 }
 0x31f   :  { %v536_v44 = vadd.f32 %v1056_v40, %v535_v43  ;;  %v1219_v45 = vpop.f32.mrb[10].mxu0  ;;  %v1351_v43 = vld [vmem:[#allocation13 + $0x38] sm:$0xff]  }
 0x320   :  { %v547_v46 = vadd.f32 %v1219_v45, %v1056_v40  ;;  %v538_v47 = vpop.f32.mrb[11].mxu0  ;;  %v568_v49 = vmax.f32 %v544_v42, 0.0  ;;  %v1350_v42 = vld [vmem:[#allocation13 + $0x30] sm:$0xff]  }
 0x321   :  { %v539_v48 = vadd.f32 %v1056_v40, %v538_v47  ;;  %v566_v51 = vmax.f32 %v536_v44, 0.0  ;;  %v1074_v44 = vld [vmem:[%s1779_s10] ss:$0 sm:$0xff] }
 0x322   :  { %v569_v50 = vmax.f32 %v547_v46, 0.0 }
 0x323   :  { %v567_v52 = vmax.f32 %v539_v48, 0.0 }
 0x324   :  { %v575_v53 = vpack.c.bf16 %v569_v50, %v568_v49 }
 0x325   :  { %v574_v54 = vpack.c.bf16 %v567_v52, %v566_v51  ;;  %v1222_v55 = vpop.f32.mrb[12].mxu0 }
 0x326   :  { %v560_v56 = vadd.f32 %v1222_v55, %v1056_v40  ;;  %v551_v57 = vpop.f32.mrb[13].mxu0 }
 0x327   :  { %v552_v58 = vadd.f32 %v1056_v40, %v551_v57  ;;  %v1223_v59 = vpop.f32.mrb[14].mxu0  ;;  %1240 = vmatprep.mubr.bf16.mxu1 %v574_v54 }
 0x328   :  { %v563_v60 = vadd.f32 %v1223_v59, %v1056_v40  ;;  %v554_v61 = vpop.f32.mrb[15].mxu0  ;;  %1241 = vmatmul.mubr.bf16.vlgmr.msra.gmra.mrb[8].mxu1 %v575_v53  ;;  %v572_v63 = vmax.f32 %v560_v56, 0.0 }
 0x329   :  { %v555_v62 = vadd.f32 %v1056_v40, %v554_v61  ;;  %v570_v1 = vmax.f32 %v552_v58, 0.0  ;;  %1273 = vmatpush3.bf16.msra.mxu1 %v1344_v7 }
 0x32a   :  { %v573_v0 = vmax.f32 %v563_v60, 0.0  ;;  %1274 = vmatprep.subr.bf16.mxu1 %v1345_v8 }
 0x32b   :  { %v571_v2 = vmax.f32 %v555_v62, 0.0 }
 0x32c   :  { %v577_v3 = vpack.c.bf16 %v573_v0, %v572_v63 }
 0x32d   :  { %v576_v4 = vpack.c.bf16 %v571_v2, %v570_v1  ;;  %1275 = vmatpush3.bf16.msra.mxu1 %v1345_v8 }
 0x32e   :  { %1276 = vmatprep.subr.bf16.mxu1 %v1346_v9 }
 0x32f   :  { %1244 = vmatprep.mubr.bf16.mxu1 %v576_v4 }
 0x330   :  { %1245 = vmatmul.mubr.bf16.gmra.mrb[12].mxu1 %v577_v3 }
 0x331   :  { %1277 = vmatpush3.bf16.msra.mxu1 %v1346_v9  ;;  %v1083_v9 = vld [vmem:[%s1781_s12] ss:$0 sm:$0xff]  ;;  %s1506_s12 = scalar_lea.vmem %s1024_s3, 1024 }
 0x332   :  { %1278 = vmatprep.subr.bf16.mxu1 %v1347_v10  ;;  %p1507_p0 = scmp.ne.s32.totalorder %s1024_s3, %s1506_s12  ;;  %p1512_p2 = scmp.lt.s32.totalorder %s1506_s12, %s1506_s12 }
 0x334   :  { %p1513_p3 = por %p1512_p2, %p1511_p1 }
 0x335   :  { %1279 = vmatpush3.bf16.msra.mxu1 %v1347_v10 }
 0x336   :  { %1280 = vmatprep.subr.bf16.mxu1 %v1348_v11  ;;  %p1514_p4 = pnand %p1513_p3, %p1507_p0 }
 0x339   :  { %1281 = vmatpush3.bf16.msra.mxu1 %v1348_v11 }
 0x33a   :  { %1282 = vmatprep.subr.bf16.mxu1 %v1349_v12 }
 0x33d   :  { %1283 = vmatpush3.bf16.msra.mxu1 %v1349_v12 }
 0x33e   :  { %1284 = vmatprep.subr.bf16.mxu1 %v1350_v42 }
 0x341   :  { %1285 = vmatpush3.bf16.msra.mxu1 %v1350_v42 }
 0x342   :  { %1286 = vmatprep.subr.bf16.mxu1 %v1351_v43 }
 0x345   :  { %1287 = vmatpush3.bf16.msra.mxu1 %v1351_v43 }
 0x3fb   :  { %v1242_v14 = vpop.f32.mrb[8].mxu1 }
 0x3fc   :  { %v692_v15 = vadd.f32 %v1242_v14, %v1065_v13  ;;  %v683_v16 = vpop.f32.mrb[9].mxu1 }
 0x3fd   :  { %v684_v17 = vadd.f32 %v1065_v13, %v683_v16  ;;  %v1243_v18 = vpop.f32.mrb[10].mxu1 }
 0x3fe   :  { %v695_v19 = vadd.f32 %v1243_v18, %v1065_v13  ;;  %v686_v20 = vpop.f32.mrb[11].mxu1  ;;  %v716_v22 = vmax.f32 %v692_v15, 0.0 }
 0x3ff   :  { %v687_v21 = vadd.f32 %v1065_v13, %v686_v20  ;;  %v714_v24 = vmax.f32 %v684_v17, 0.0 }
 0x400   :  { %v717_v23 = vmax.f32 %v695_v19, 0.0 }
 0x401   :  { %v715_v25 = vmax.f32 %v687_v21, 0.0 }
 0x402   :  { %v723_v26 = vpack.c.bf16 %v717_v23, %v716_v22 }
 0x403   :  { %v722_v27 = vpack.c.bf16 %v715_v25, %v714_v24  ;;  %v1246_v28 = vpop.f32.mrb[12].mxu1 }
 0x404   :  { %v708_v29 = vadd.f32 %v1246_v28, %v1065_v13  ;;  %v699_v30 = vpop.f32.mrb[13].mxu1 }
 0x405   :  { %v700_v31 = vadd.f32 %v1065_v13, %v699_v30  ;;  %v1247_v32 = vpop.f32.mrb[14].mxu1  ;;  %1264 = vmatprep.mubr.bf16.mxu0 %v722_v27 }
 0x406   :  { %v711_v33 = vadd.f32 %v1247_v32, %v1065_v13  ;;  %v702_v34 = vpop.f32.mrb[15].mxu1  ;;  %1265 = vmatmul.mubr.bf16.vlgmr.msra.gmra.mrb[16].mxu0 %v723_v26  ;;  %v720_v36 = vmax.f32 %v708_v29, 0.0 }
 0x407   :  { %v703_v35 = vadd.f32 %v1065_v13, %v702_v34  ;;  %v718_v38 = vmax.f32 %v700_v31, 0.0 }
 0x408   :  { %v721_v37 = vmax.f32 %v711_v33, 0.0 }
 0x409   :  { %v719_v39 = vmax.f32 %v703_v35, 0.0 }
 0x40a   :  { %v725_v40 = vpack.c.bf16 %v721_v37, %v720_v36 }
 0x40b   :  { %v724_v41 = vpack.c.bf16 %v719_v39, %v718_v38 }
 0x40d   :  { %1268 = vmatprep.mubr.bf16.mxu0 %v724_v41 }
 0x40e   :  { %1269 = vmatmul.mubr.bf16.gmra.mrb[20].mxu0 %v725_v40 }
 0x4d9   :  { %v1266_v45 = vpop.f32.mrb[16].mxu0 }
 0x4da   :  { %v840_v46 = vadd.f32 %v1266_v45, %v1074_v44  ;;  %v831_v47 = vpop.f32.mrb[17].mxu0 }
 0x4db   :  { %v832_v48 = vadd.f32 %v1074_v44, %v831_v47  ;;  %v1267_v49 = vpop.f32.mrb[18].mxu0 }
 0x4dc   :  { %v843_v50 = vadd.f32 %v1267_v49, %v1074_v44  ;;  %v834_v51 = vpop.f32.mrb[19].mxu0  ;;  %v864_v53 = vmax.f32 %v840_v46, 0.0 }
 0x4dd   :  { %v835_v52 = vadd.f32 %v1074_v44, %v834_v51  ;;  %v862_v55 = vmax.f32 %v832_v48, 0.0 }
 0x4de   :  { %v865_v54 = vmax.f32 %v843_v50, 0.0 }
 0x4df   :  { %v863_v56 = vmax.f32 %v835_v52, 0.0 }
 0x4e0   :  { %v871_v57 = vpack.c.bf16 %v865_v54, %v864_v53 }
 0x4e1   :  { %v870_v58 = vpack.c.bf16 %v863_v56, %v862_v55  ;;  %v1270_v59 = vpop.f32.mrb[20].mxu0 }
 0x4e2   :  { %v856_v60 = vadd.f32 %v1270_v59, %v1074_v44  ;;  %v847_v61 = vpop.f32.mrb[21].mxu0 }
 0x4e3   :  { %v848_v62 = vadd.f32 %v1074_v44, %v847_v61  ;;  %v1271_v63 = vpop.f32.mrb[22].mxu0  ;;  %1288 = vmatprep.mubr.bf16.mxu1 %v870_v58 }
 0x4e4   :  { %v859_v0 = vadd.f32 %v1271_v63, %v1074_v44  ;;  %v850_v1 = vpop.f32.mrb[23].mxu0  ;;  %1289 = vmatmul.mubr.bf16.vlgmr.msra.gmra.mrb[16].mxu1 %v871_v57  ;;  %v868_v3 = vmax.f32 %v856_v60, 0.0 }
 0x4e5   :  { %v851_v2 = vadd.f32 %v1074_v44, %v850_v1  ;;  %v866_v5 = vmax.f32 %v848_v62, 0.0 }
 0x4e6   :  { %v869_v4 = vmax.f32 %v859_v0, 0.0 }
 0x4e7   :  { %v867_v6 = vmax.f32 %v851_v2, 0.0 }
 0x4e8   :  { %v873_v7 = vpack.c.bf16 %v869_v4, %v868_v3 }
 0x4e9   :  { %v872_v8 = vpack.c.bf16 %v867_v6, %v866_v5 }
 0x4eb   :  { %1292 = vmatprep.mubr.bf16.mxu1 %v872_v8 }
 0x4ec   :  { %1293 = vmatmul.mubr.bf16.gmra.mrb[20].mxu1 %v873_v7 }
 0x5b7   :  { %v1290_v10 = vpop.f32.mrb[16].mxu1 }
 0x5b8   :  { %v988_v11 = vadd.f32 %v1290_v10, %v1083_v9  ;;  %v979_v12 = vpop.f32.mrb[17].mxu1 }
 0x5b9   :  { %v980_v13 = vadd.f32 %v1083_v9, %v979_v12  ;;  %v1291_v14 = vpop.f32.mrb[18].mxu1 }
 0x5ba   :  { %1012 = vst [vmem:[#allocation14 + $0x10] sm:$0xff] %v988_v11  ;;  %v991_v15 = vadd.f32 %v1291_v14, %v1083_v9  ;;  %v982_v16 = vpop.f32.mrb[19].mxu1 }
 0x5bb   :  { %1010 = vst [vmem:[#allocation14] sm:$0xff] %v980_v13  ;;  %v983_v17 = vadd.f32 %v1083_v9, %v982_v16 }
 0x5bc   :  { %1013 = vst [vmem:[#allocation14 + $0x18] sm:$0xff] %v991_v15 }
 0x5bd   :  { %1011 = vst [vmem:[#allocation14 + $0x8] sm:$0xff] %v983_v17 }
 0x5bf   :  { %v1294_v18 = vpop.f32.mrb[20].mxu1 }
 0x5c0   :  { %v1004_v19 = vadd.f32 %v1294_v18, %v1083_v9  ;;  %v995_v20 = vpop.f32.mrb[21].mxu1 }
 0x5c1   :  { %v996_v21 = vadd.f32 %v1083_v9, %v995_v20  ;;  %v1295_v22 = vpop.f32.mrb[22].mxu1 }
 0x5c2   :  { %1016 = vst [vmem:[#allocation14 + $0x30] sm:$0xff] %v1004_v19  ;;  %v1007_v23 = vadd.f32 %v1295_v22, %v1083_v9  ;;  %v998_v24 = vpop.f32.mrb[23].mxu1 }
 0x5c3   :  { %1014 = vst [vmem:[#allocation14 + $0x20] sm:$0xff] %v996_v21  ;;  %v999_v25 = vadd.f32 %v1083_v9, %v998_v24 }
 0x5c4   :  { %1017 = vst [vmem:[#allocation14 + $0x38] sm:$0xff] %v1007_v23 }
 0x5c5   :  { %1015 = vst [vmem:[#allocation14 + $0x28] sm:$0xff] %v999_v25 }
 0x5c6   :  { %1517 = shalt.err (!%p1514_p4)
}
 0x5c7   :  { %s1518_s17 = scalar_lea.hbm %s1782_s13, 1024 }
 0x5c8   :  { %p1519_p5 = scmp.ne.s32.totalorder %s1782_s13, %s1518_s17  ;;  %p1522_p6 = scmp.lt.u32.totalorder %s1518_s17, %s1782_s13 }
 0x5ca   :  { %p1524_p7 = pnand %p1522_p6, %p1519_p5 }
 0x5cc   :  { %1527 = shalt.err (!%p1524_p7)
}
 0x5cd   :  { %1029 = dma.vmem_to_hbm [thread:$0]  %s1024_s3, 1024, %s1782_s13, [#allocation4], %s1544_s9, %s1544_s9, %s1545_s25  }
 0x5ce   :  { %1536 = dma.done.wait [#allocation4], 1024  }
 0x5cf   :  { %1537 = vsyncadd [#allocation4], 4294966272 }
 0x5d0   :  { %1033 = vsyncpa [#allocation3], 1 }
 0x5d1   :  { %1034 = vsyncpa [#allocation6], 1 }
 0x5d2   :  { %1035 = vsyncpa [#allocation9], 1 }
 0x5d3   :  { %1036 = vsyncpa [#allocation12], 1 }
 0x5d4   :  { %1037 = vsyncpa [#allocation4], 1 }

</bundles_post_ra>
